<compile_context>
chip_gen: v5e
topology: v5e:2x2
jax: 0.10.0
libtpu: 0.0.40
codegen_flags: <defaults>
</compile_context>

<pallas_src>
import functools

import jax
import jax.numpy as jnp
from jax.experimental import pallas as pl
from jax.experimental.pallas import tpu as pltpu

# Synthetic stand-in for config.SHAPE
SHAPE = [(32, 64), (64, 64), (64, 16)]

_LANE = 128  # TPU lane width


def _round_up(n, m):
    return ((n + m - 1) // m) * m


def mlp_kernel(x_ref, w1_ref, b1_ref, w2_ref, b2_ref, w3_ref, b3_ref, o_ref):
    """Fused 3-layer MLP on one batch tile. All operands resident in VMEM.

    Matmuls accumulate in f32 (preferred_element_type); activations are cast
    back to the weight dtype before the next MXU op so bf16 inputs stay on the
    fast MXU path. Output tile is lane-dense (last dim padded to 128).
    """
    w_dtype = w1_ref.dtype
    x = x_ref[...]

    # HiddenLayer1 + ReLU
    h1 = jnp.dot(x, w1_ref[...], preferred_element_type=jnp.float32) + b1_ref[...]
    h1 = jnp.maximum(h1, 0.0).astype(w_dtype)

    # HiddenLayer2 + ReLU
    h2 = jnp.dot(h1, w2_ref[...], preferred_element_type=jnp.float32) + b2_ref[...]
    h2 = jnp.maximum(h2, 0.0).astype(w_dtype)

    # OutputLayer (no activation); padded output columns stay zero because the
    # padded w3/b3 columns are zero.
    out = jnp.dot(h2, w3_ref[...], preferred_element_type=jnp.float32) + b3_ref[...]
    o_ref[...] = out.astype(o_ref.dtype)


@functools.partial(jax.jit, static_argnames=("block_b", "compute_dtype"))
def mlp_forward(x, w1, b1, w2, b2, w3, b3, *, block_b=256, compute_dtype=None):
    """Forward pass of the 3-layer MLP via a single fused Pallas kernel.

    block_b:       batch tile (rows per grid step). Padded batch is processed;
                   the result is sliced back to the caller's batch size.
    compute_dtype: if set (e.g. jnp.bfloat16), x and the weight matrices are
                   cast before the kernel; accumulation stays f32.
    """
    B, d_in = x.shape
    d_out = w3.shape[1]
    out_dtype = x.dtype

    # Shrink the tile for tiny batches (keep it a multiple of 16 so both f32
    # and bf16 sublane tiling constraints are satisfied).
    block_b = max(16, min(block_b, _round_up(B, 16)))

    # --- batch padding so any B works with the chosen block_b ---
    num_tiles = pl.cdiv(B, block_b)
    b_pad = num_tiles * block_b
    if b_pad != B:
        x = jnp.pad(x, ((0, b_pad - B), (0, 0)))

    # --- lane-dense output: pad d_out up to a multiple of 128 with zeros ---
    d_out_pad = _round_up(d_out, _LANE)
    if d_out_pad != d_out:
        w3 = jnp.pad(w3, ((0, 0), (0, d_out_pad - d_out)))
        b3 = jnp.pad(b3, ((0, 0), (0, d_out_pad - d_out)))

    # --- optional reduced-precision compute (v6e/v7x: bf16 MXU-native) ---
    if compute_dtype is not None:
        x = x.astype(compute_dtype)
        w1 = w1.astype(compute_dtype)
        w2 = w2.astype(compute_dtype)
        w3 = w3.astype(compute_dtype)
        # biases stay f32: they are added to the f32 accumulator.

    def weight_spec(shape):
        # Full weight / bias, constant index_map -> resident in VMEM, no
        # re-DMA across grid steps.
        return pl.BlockSpec(shape, lambda i: (0, 0))

    out_padded = pl.pallas_call(
        mlp_kernel,
        out_shape=jax.ShapeDtypeStruct((b_pad, d_out_pad), out_dtype),
        grid_spec=pltpu.PrefetchScalarGridSpec(
            num_scalar_prefetch=0,
            grid=(num_tiles,),
            in_specs=[
                pl.BlockSpec((block_b, d_in), lambda i: (i, 0)),  # x tile
                weight_spec(w1.shape),
                weight_spec(b1.shape),
                weight_spec(w2.shape),
                weight_spec(b2.shape),
                weight_spec(w3.shape),
                weight_spec(b3.shape),
            ],
            out_specs=pl.BlockSpec((block_b, d_out_pad), lambda i: (i, 0)),
        ),
        compiler_params=pltpu.CompilerParams(
            # Batch axis is embarrassingly parallel -> megacore sharding on v7x.
            dimension_semantics=("parallel",),
        ),
    )(x, w1, b1, w2, b2, w3, b3)

    # Strip batch + lane padding.
    return out_padded[:B, :d_out]


def init_linear_params(key, d_in, d_out, dtype=jnp.float32):
    """Deterministic init matching nn.Linear's U(-1/sqrt(in), 1/sqrt(in))."""
    k_w, k_b = jax.random.split(key)
    bound = 1.0 / jnp.sqrt(jnp.array(d_in, dtype=dtype))
    # Stored as (in, out) so the kernel does x @ W + b.
    w = jax.random.uniform(k_w, (d_in, d_out), dtype, -bound, bound)
    b = jax.random.uniform(k_b, (1, d_out), dtype, -bound, bound)
    return w, b


def reference_forward(x, w1, b1, w2, b2, w3, b3):
    h1 = jnp.maximum(x @ w1 + b1, 0.0)
    h2 = jnp.maximum(h1 @ w2 + b2, 0.0)
    return h2 @ w3 + b3


if __name__ == "__main__":
    key = jax.random.PRNGKey(0)
    k_x, k1, k2, k3 = jax.random.split(key, 4)

    # Non-multiple-of-block batch exercises the cdiv + padded-tail path, and
    # with block_b=256 produces a 2-step grid (both v7x TensorCores busy).
    batch = 300
    x = jax.random.normal(k_x, (batch, SHAPE[0][0]), jnp.float32)

    w1, b1 = init_linear_params(k1, *SHAPE[0])
    w2, b2 = init_linear_params(k2, *SHAPE[1])
    w3, b3 = init_linear_params(k3, *SHAPE[2])

    ref = reference_forward(x, w1, b1, w2, b2, w3, b3)

    # f32 path (default; preferred on v5e).
    out = mlp_forward(x, w1, b1, w2, b2, w3, b3, block_b=256)
    out = jax.block_until_ready(out)
    assert out.shape == (batch, SHAPE[2][1])
    assert jnp.allclose(out, ref, atol=1e-5, rtol=1e-5), "f32 mismatch vs reference"

    # bf16 compute path (preferred on v6e/v7x); f32 accumulation keeps numerics.
    out_bf16 = mlp_forward(
        x, w1, b1, w2, b2, w3, b3, block_b=256, compute_dtype=jnp.bfloat16
    )
    out_bf16 = jax.block_until_ready(out_bf16)
    assert out_bf16.shape == (batch, SHAPE[2][1])
    assert jnp.allclose(out_bf16, ref, atol=5e-2, rtol=5e-2), "bf16 mismatch vs reference"

    print("KERNEL_OK")
</pallas_src>

<mosaic_0001>
module attributes {stable_mosaic.version = 11 : i64} {
  func.func @mlp_kernel(%arg0: i32, %arg1: memref<256x32xf32, #tpu.memory_space<vmem>>, %arg2: memref<32x64xf32, #tpu.memory_space<vmem>>, %arg3: memref<1x64xf32, #tpu.memory_space<vmem>>, %arg4: memref<64x64xf32, #tpu.memory_space<vmem>>, %arg5: memref<1x64xf32, #tpu.memory_space<vmem>>, %arg6: memref<64x128xf32, #tpu.memory_space<vmem>>, %arg7: memref<1x128xf32, #tpu.memory_space<vmem>>, %arg8: memref<256x128xf32, #tpu.memory_space<vmem>>) attributes {dimension_semantics = [#tpu.dimension_semantics<parallel>], iteration_bounds = array<i64: 2>, scalar_prefetch = 0 : i64, scratch_operands = 0 : i64, tpu.core_type = #tpu.core_type<tc>, window_params = [{transform_indices = @transform_0, window_bounds = array<i64: 256, 32>}, {pipeline_mode = #tpu.pipeline_mode<synchronous>, transform_indices = @transform_1, window_bounds = array<i64: 32, 64>}, {pipeline_mode = #tpu.pipeline_mode<synchronous>, transform_indices = @transform_2, window_bounds = array<i64: 1, 64>}, {pipeline_mode = #tpu.pipeline_mode<synchronous>, transform_indices = @transform_3, window_bounds = array<i64: 64, 64>}, {pipeline_mode = #tpu.pipeline_mode<synchronous>, transform_indices = @transform_4, window_bounds = array<i64: 1, 64>}, {pipeline_mode = #tpu.pipeline_mode<synchronous>, transform_indices = @transform_5, window_bounds = array<i64: 64, 128>}, {pipeline_mode = #tpu.pipeline_mode<synchronous>, transform_indices = @transform_6, window_bounds = array<i64: 1, 128>}, {transform_indices = @transform_7, window_bounds = array<i64: 256, 128>}]} {
    %c0 = arith.constant 0 : index
    %c0_0 = arith.constant 0 : index
    %0 = vector.load %arg1[%c0, %c0_0] : memref<256x32xf32, #tpu.memory_space<vmem>>, vector<256x32xf32>
    %c0_1 = arith.constant 0 : index
    %c0_2 = arith.constant 0 : index
    %1 = vector.load %arg2[%c0_1, %c0_2] : memref<32x64xf32, #tpu.memory_space<vmem>>, vector<32x64xf32>
    %cst = arith.constant dense<0.000000e+00> : vector<256x64xf32>
    %2 = tpu.matmul %0, %1, %cst {dimension_numbers = #tpu.dot_dimension_numbers<[1], [0], [0], [1], [0, 0, 1, 1], [], []>} : vector<256x32xf32>, vector<32x64xf32>, vector<256x64xf32> -> vector<256x64xf32>
    %c0_3 = arith.constant 0 : index
    %c0_4 = arith.constant 0 : index
    %3 = vector.load %arg3[%c0_3, %c0_4] : memref<1x64xf32, #tpu.memory_space<vmem>>, vector<1x64xf32>
    %4 = vector.broadcast %3 : vector<1x64xf32> to vector<256x64xf32>
    %5 = arith.addf %2, %4 : vector<256x64xf32>
    %cst_5 = arith.constant 0.000000e+00 : f32
    %6 = vector.broadcast %cst_5 : f32 to vector<256x64xf32>
    %7 = arith.maximumf %5, %6 : vector<256x64xf32>
    %c0_6 = arith.constant 0 : index
    %c0_7 = arith.constant 0 : index
    %8 = vector.load %arg4[%c0_6, %c0_7] : memref<64x64xf32, #tpu.memory_space<vmem>>, vector<64x64xf32>
    %cst_8 = arith.constant dense<0.000000e+00> : vector<256x64xf32>
    %9 = tpu.matmul %7, %8, %cst_8 {dimension_numbers = #tpu.dot_dimension_numbers<[1], [0], [0], [1], [0, 0, 1, 1], [], []>} : vector<256x64xf32>, vector<64x64xf32>, vector<256x64xf32> -> vector<256x64xf32>
    %c0_9 = arith.constant 0 : index
    %c0_10 = arith.constant 0 : index
    %10 = vector.load %arg5[%c0_9, %c0_10] : memref<1x64xf32, #tpu.memory_space<vmem>>, vector<1x64xf32>
    %11 = vector.broadcast %10 : vector<1x64xf32> to vector<256x64xf32>
    %12 = arith.addf %9, %11 : vector<256x64xf32>
    %cst_11 = arith.constant 0.000000e+00 : f32
    %13 = vector.broadcast %cst_11 : f32 to vector<256x64xf32>
    %14 = arith.maximumf %12, %13 : vector<256x64xf32>
    %c0_12 = arith.constant 0 : index
    %c0_13 = arith.constant 0 : index
    %15 = vector.load %arg6[%c0_12, %c0_13] : memref<64x128xf32, #tpu.memory_space<vmem>>, vector<64x128xf32>
    %cst_14 = arith.constant dense<0.000000e+00> : vector<256x128xf32>
    %16 = tpu.matmul %14, %15, %cst_14 {dimension_numbers = #tpu.dot_dimension_numbers<[1], [0], [0], [1], [0, 0, 1, 1], [], []>} : vector<256x64xf32>, vector<64x128xf32>, vector<256x128xf32> -> vector<256x128xf32>
    %c0_15 = arith.constant 0 : index
    %c0_16 = arith.constant 0 : index
    %17 = vector.load %arg7[%c0_15, %c0_16] : memref<1x128xf32, #tpu.memory_space<vmem>>, vector<1x128xf32>
    %18 = vector.broadcast %17 : vector<1x128xf32> to vector<256x128xf32>
    %19 = arith.addf %16, %18 : vector<256x128xf32>
    %c0_17 = arith.constant 0 : index
    %c0_18 = arith.constant 0 : index
    %20 = vector.load %arg8[%c0_17, %c0_18] : memref<256x128xf32, #tpu.memory_space<vmem>>, vector<256x128xf32>
    tpu.vector_store %arg8[%c0_17, %c0_18], %19 {strides = array<i32>} : memref<256x128xf32, #tpu.memory_space<vmem>>, vector<256x128xf32>,
    return
  }
  func.func @transform_0(%arg0: i32) -> (i32, i32) {
    %c0_i32 = arith.constant 0 : i32
    %c0_i32_0 = arith.constant 0 : i32
    return %arg0, %c0_i32 : i32, i32
  }
  func.func @transform_1(%arg0: i32) -> (i32, i32) {
    %c0_i32 = arith.constant 0 : i32
    %c0_i32_0 = arith.constant 0 : i32
    %c0_i32_1 = arith.constant 0 : i32
    return %c0_i32, %c0_i32_0 : i32, i32
  }
  func.func @transform_2(%arg0: i32) -> (i32, i32) {
    %c0_i32 = arith.constant 0 : i32
    %c0_i32_0 = arith.constant 0 : i32
    %c0_i32_1 = arith.constant 0 : i32
    return %c0_i32, %c0_i32_0 : i32, i32
  }
  func.func @transform_3(%arg0: i32) -> (i32, i32) {
    %c0_i32 = arith.constant 0 : i32
    %c0_i32_0 = arith.constant 0 : i32
    %c0_i32_1 = arith.constant 0 : i32
    return %c0_i32, %c0_i32_0 : i32, i32
  }
  func.func @transform_4(%arg0: i32) -> (i32, i32) {
    %c0_i32 = arith.constant 0 : i32
    %c0_i32_0 = arith.constant 0 : i32
    %c0_i32_1 = arith.constant 0 : i32
    return %c0_i32, %c0_i32_0 : i32, i32
  }
  func.func @transform_5(%arg0: i32) -> (i32, i32) {
    %c0_i32 = arith.constant 0 : i32
    %c0_i32_0 = arith.constant 0 : i32
    %c0_i32_1 = arith.constant 0 : i32
    return %c0_i32, %c0_i32_0 : i32, i32
  }
  func.func @transform_6(%arg0: i32) -> (i32, i32) {
    %c0_i32 = arith.constant 0 : i32
    %c0_i32_0 = arith.constant 0 : i32
    %c0_i32_1 = arith.constant 0 : i32
    return %c0_i32, %c0_i32_0 : i32, i32
  }
  func.func @transform_7(%arg0: i32) -> (i32, i32) {
    %c0_i32 = arith.constant 0 : i32
    %c0_i32_0 = arith.constant 0 : i32
    return %arg0, %c0_i32 : i32, i32
  }
}

</mosaic_0001>

<bundles_post_ra>
// kernel: mlp_forward.1
= control target key start
LH: loop header
LB: loop body
LE: loop exit
PB: predicated region body
PF: predicated region fallthrough
CT: control target
= control target key end

     0   :  { %s1313_s24 = smov 0   ;;  %s1672_s0 = inlined_call_operand.vmem [shape: f32[512,32], index: 0, kind: input, shape index: {}]   ;;  %s1673_s1 = inlined_call_operand.vmem [shape: f32[32,64], index: 1, kind: input, shape index: {}]   ;;  %s1674_s2 = inlined_call_operand.vmem [shape: f32[1,64], index: 2, kind: input, shape index: {}]   ;;  %s1675_s3 = inlined_call_operand.vmem [shape: f32[64,64], index: 3, kind: input, shape index: {}]   ;;  %s1676_s4 = inlined_call_operand.vmem [shape: f32[1,64], index: 4, kind: input, shape index: {}]   ;;  %s1677_s5 = inlined_call_operand.vmem [shape: f32[64,128], index: 5, kind: input, shape index: {}]   ;;  %s1678_s6 = inlined_call_operand.vmem [shape: f32[1,128], index: 6, kind: input, shape index: {}]   ;;  %s1679_s7 = inlined_call_operand.vmem [shape: f32[512,128], index: 7, kind: output, shape index: {}]  }
   0x1 LB: > { %s1127_s25 = sadd.s32 4294967295, %s1271_s24   ;;  %p1131_p0 = scmp.ge.s32.totalorder %s1271_s24, 1  ;;  %s1271_s24 = sphi %s1313_s24, %s17_s24  }
   0x2   : > { %p238_p1 = scmp.lt.s32.totalorder %s1271_s24, 3 }
   0x4   : > { %p239_p2 = pnand %p1131_p0, %p238_p1 }
   0x5   : > { %s1132_s30 = sshll.u32 (!%p239_p2), %s1127_s25, 5 }
   0x6   : > { %242 = sbr.rel (%p239_p2) target bundleno = 668 (0x29c), region = 48  ;;  %p271_p3 = scmp.lt.s32.totalorder (!%p239_p2), %s1132_s30, 63 }
   0xb   : > { %v317_v0 = vld [vmem:[%s1673_s1 + $0x18] sm:$0xff]  ;;  %v316_v1 = vld [vmem:[%s1673_s1 + $0x10] sm:$0xff]  ;;  %v315_v2 = vld [vmem:[%s1673_s1 + $0x8] sm:$0xff]  ;;  %s1681_s30 = smov (!%p271_p3, %s1132_s30), 63  ;;  %vm322_vm0 = vcmask 261120   ;;  %vm576_vm1 = vcmask 523264  }
   0xc   : > { %431 = vmatpush.msra.mxu0 %v317_v0  ;;  %1234 = vmatpush.msra.mxu3 %v317_v0  ;;  %v314_v3 = vld [vmem:[%s1673_s1] sm:$0xff]  ;;  %s1133_s12 = sshll.u32 %s1681_s30, 3  ;;  %v571_v15 = vld [vmem:[%s1675_s3 + $0x38] sm:$0xff]  ;;  %v570_v16 = vld [vmem:[%s1675_s3 + $0x30] sm:$0xff] }
   0xd   : > { %s1341_s15 = scalar_lea.vmem %s1672_s0, %s1133_s12  ;;  %681 = vmatpush.msra.mxu1 %v571_v15  ;;  %v569_v17 = vld [vmem:[%s1675_s3 + $0x28] sm:$0xff]  ;;  %v568_v19 = vld [vmem:[%s1675_s3 + $0x20] sm:$0xff]  ;;  %v567_v20 = vld [vmem:[%s1675_s3 + $0x18] sm:$0xff]  ;;  %s1573_s17 = scalar_lea.vmem %s1679_s7, %s1133_s12 }
   0xe   : > { %432 = vmatpush.msra.mxu0 %v316_v1  ;;  %1235 = vmatpush.msra.mxu3 %v316_v1  ;;  %v282_v4 = vld [vmem:[%s1341_s15] sm:$0xff]  ;;  %v283_v5 = vld [vmem:[%s1341_s15 + $0x8] sm:$0xff]  ;;  %v284_v6 = vld [vmem:[%s1341_s15 + $0x10] sm:$0xff] }
   0xf   : > { %v285_v7 = vld [vmem:[%s1341_s15 + $0x18] sm:$0xff]  ;;  %v286_v8 = vld [vmem:[%s1341_s15 + $0x20] sm:$0xff]  ;;  %v287_v9 = vld [vmem:[%s1341_s15 + $0x28] sm:$0xff]  ;;  %682 = vmatpush.msra.mxu1 %v570_v16 }
  0x10   : > { %433 = vmatpush.msra.mxu0 %v315_v2  ;;  %1236 = vmatpush.msra.mxu3 %v315_v2  ;;  %v288_v10 = vld [vmem:[%s1341_s15 + $0x30] sm:$0xff]  ;;  %v289_v11 = vld [vmem:[%s1341_s15 + $0x38] sm:$0xff]  ;;  %v290_v12 = vld [vmem:[%s1341_s15 + $0x40] sm:$0xff] }
  0x11   : > { %v291_v13 = vld [vmem:[%s1341_s15 + $0x48] sm:$0xff]  ;;  %v292_v14 = vld [vmem:[%s1341_s15 + $0x50] sm:$0xff]  ;;  %v293_v18 = vld [vmem:[%s1341_s15 + $0x58] sm:$0xff]  ;;  %683 = vmatpush.msra.mxu1 %v569_v17 }
  0x12   : > { %434 = vmatpush.msra.mxu0 %v314_v3  ;;  %1237 = vmatpush.msra.mxu3 %v314_v3  ;;  %v566_v21 = vld [vmem:[%s1675_s3 + $0x10] sm:$0xff]  ;;  %v294_v22 = vld [vmem:[%s1341_s15 + $0x60] sm:$0xff]  ;;  %v565_v23 = vld [vmem:[%s1675_s3 + $0x8] sm:$0xff] }
  0x13   : > { %1136 = vmatmul.msk.f32.vlgmr.msra.gmra.mxu0 %vm322_vm0, %v282_v4  ;;  %684 = vmatpush.msra.mxu1 %v568_v19  ;;  %v564_v24 = vld [vmem:[%s1675_s3] sm:$0xff]  ;;  %v295_v25 = vld [vmem:[%s1341_s15 + $0x68] sm:$0xff]  ;;  %v296_v26 = vld [vmem:[%s1341_s15 + $0x70] sm:$0xff] }
  0x14   : > { %1238 = vmatpush.msrb.mxu3 %v571_v15  ;;  %v297_v27 = vld [vmem:[%s1341_s15 + $0x78] sm:$0xff]  ;;  %v1402_v28 = vld [vmem:[%s1674_s2] ss:$0 sm:$0xff]  ;;  %v299_v34 = vld [vmem:[%s1341_s15 + $0x88] sm:$0xff] }
  0x15   : > { %685 = vmatpush.msra.mxu1 %v567_v20  ;;  %v298_v30 = vld [vmem:[%s1341_s15 + $0x80] sm:$0xff]  ;;  %v300_v38 = vld [vmem:[%s1341_s15 + $0x90] sm:$0xff]  ;;  %v301_v42 = vld [vmem:[%s1341_s15 + $0x98] sm:$0xff] }
  0x16   : > { %1239 = vmatpush.msrb.mxu3 %v570_v16  ;;  %v302_v46 = vld [vmem:[%s1341_s15 + $0xa0] sm:$0xff]  ;;  %v307_v49 = vld [vmem:[%s1341_s15 + $0xc8] sm:$0xff]  ;;  %v308_v54 = vld [vmem:[%s1341_s15 + $0xd0] sm:$0xff] }
  0x17   : > { %686 = vmatpush.msra.mxu1 %v566_v21  ;;  %1161 = vmatmul.msk.f32.vlgmr.msra.gmra.mxu3 %vm322_vm0, %v307_v49  ;;  %v303_v51 = vld [vmem:[%s1341_s15 + $0xa8] sm:$0xff]  ;;  %v304_v56 = vld [vmem:[%s1341_s15 + $0xb0] sm:$0xff]  ;;  %v309_v59 = vld [vmem:[%s1341_s15 + $0xd8] sm:$0xff] }
  0x18   : > { %1240 = vmatpush.msrb.mxu3 %v569_v17  ;;  %v305_v61 = vld [vmem:[%s1341_s15 + $0xb8] sm:$0xff]  ;;  %v310_v0 = vld [vmem:[%s1341_s15 + $0xe0] sm:$0xff]  ;;  %v824_v17 = vld [vmem:[%s1677_s5 + $0x30] sm:$0xff] }
  0x19   : > { %687 = vmatpush.msra.mxu1 %v565_v23  ;;  %v306_v2 = vld [vmem:[%s1341_s15 + $0xc0] sm:$0xff] }
  0x1a   : > { %1241 = vmatpush.msrb.mxu3 %v568_v19  ;;  %v823_v19 = vld [vmem:[%s1677_s5 + $0x28] sm:$0xff] }
  0x1b   : > { %1137 = vmatmul.msk.f32.gmra.mxu0 %vm322_vm0, %v283_v5  ;;  %688 = vmatpush.msra.mxu1 %v564_v24  ;;  %v311_v5 = vld [vmem:[%s1341_s15 + $0xe8] sm:$0xff] }
  0x1c   : > { %1242 = vmatpush.msrb.mxu3 %v567_v20  ;;  %v822_v20 = vld [vmem:[%s1677_s5 + $0x20] sm:$0xff] }
  0x1e   : > { %1243 = vmatpush.msrb.mxu3 %v566_v21  ;;  %v821_v21 = vld [vmem:[%s1677_s5 + $0x18] sm:$0xff] }
  0x1f   : > { %1162 = vmatmul.msk.f32.gmra.mxu3 %vm322_vm0, %v308_v54 }
  0x20   : > { %1244 = vmatpush.msrb.mxu3 %v565_v23 }
  0x22   : > { %1245 = vmatpush.msrb.mxu3 %v564_v24  ;;  %v820_v24 = vld [vmem:[%s1677_s5 + $0x10] sm:$0xff] }
  0x23   : > { %1138 = vmatmul.msk.f32.gmra.mxu0 %vm322_vm0, %v284_v6 }
  0x27   : > { %1163 = vmatmul.msk.f32.gmra.mxu3 %vm322_vm0, %v309_v59 }
  0x2b   : > { %1139 = vmatmul.msk.f32.gmra.mxu0 %vm322_vm0, %v285_v7 }
  0x2f   : > { %1164 = vmatmul.msk.f32.gmra.mxu3 %vm322_vm0, %v310_v0 }
  0x33   : > { %1140 = vmatmul.msk.f32.gmra.mxu0 %vm322_vm0, %v286_v8 }
  0x37   : > { %1165 = vmatmul.msk.f32.gmra.mxu3 %vm322_vm0, %v311_v5 }
  0x3b   : > { %1141 = vmatmul.msk.f32.gmra.mxu0 %vm322_vm0, %v287_v9  ;;  %v312_v9 = vld [vmem:[%s1341_s15 + $0xf0] sm:$0xff] }
  0x3f   : > { %1166 = vmatmul.msk.f32.gmra.mxu3 %vm322_vm0, %v312_v9 }
  0x43   : > { %1142 = vmatmul.msk.f32.gmra.mxu0 %vm322_vm0, %v288_v10 }
  0x4b   : > { %1143 = vmatmul.msk.f32.gmra.mxu0 %vm322_vm0, %v289_v11 }
  0x53   : > { %1144 = vmatmul.msk.f32.gmra.mxu0 %vm322_vm0, %v290_v12 }
  0x5b   : > { %1145 = vmatmul.msk.f32.gmra.mxu0 %vm322_vm0, %v291_v13  ;;  %v313_v13 = vld [vmem:[%s1341_s15 + $0xf8] sm:$0xff] }
  0x5c   : > { %1167 = vmatmul.msk.f32.gmra.mxu3 %vm322_vm0, %v313_v13 }
  0x63   : > { %1146 = vmatmul.msk.f32.gmra.mxu0 %vm322_vm0, %v292_v14  ;;  %v825_v14 = vld [vmem:[%s1677_s5 + $0x38] sm:$0xff] }
  0x64   : > { %934 = vmatpush.msra.mxu2 %v825_v14  ;;  %1246 = vmatpush.msra.mxu3 %v825_v14 }
  0x66   : > { %935 = vmatpush.msra.mxu2 %v824_v17  ;;  %1247 = vmatpush.msra.mxu3 %v824_v17 }
  0x68   : > { %936 = vmatpush.msra.mxu2 %v823_v19  ;;  %1248 = vmatpush.msra.mxu3 %v823_v19 }
  0x6a   : > { %937 = vmatpush.msra.mxu2 %v822_v20  ;;  %1249 = vmatpush.msra.mxu3 %v822_v20 }
  0x6b   : > { %1147 = vmatmul.msk.f32.gmra.mxu0 %vm322_vm0, %v293_v18 }
  0x6c   : > { %938 = vmatpush.msra.mxu2 %v821_v21  ;;  %1250 = vmatpush.msra.mxu3 %v821_v21 }
  0x6e   : > { %939 = vmatpush.msra.mxu2 %v820_v24  ;;  %1251 = vmatpush.msra.mxu3 %v820_v24 }
  0x73   : > { %1148 = vmatmul.msk.f32.gmra.mxu0 %vm322_vm0, %v294_v22 }
  0x7b   : > { %1149 = vmatmul.msk.f32.gmra.mxu0 %vm322_vm0, %v295_v25 }
  0x83   : > { %1150 = vmatmul.msk.f32.gmra.mxu0 %vm322_vm0, %v296_v26  ;;  %v819_v26 = vld [vmem:[%s1677_s5 + $0x8] sm:$0xff] }
  0x84   : > { %940 = vmatpush.msra.mxu2 %v819_v26  ;;  %1252 = vmatpush.msra.mxu3 %v819_v26 }
  0x8b   : > { %1151 = vmatmul.msk.f32.gmra.mxu0 %vm322_vm0, %v297_v27  ;;  %v818_v27 = vld [vmem:[%s1677_s5] sm:$0xff] }
  0x8c   : > { %941 = vmatpush.msra.mxu2 %v818_v27  ;;  %1253 = vmatpush.msra.mxu3 %v818_v27 }
  0x90   : > { %v436_v29 = vpop.f32.mrf.mxu0 }
  0x91   : > { %v437_v31 = vadd.f32 %v1402_v28, %v436_v29 }
  0x93   : > { %v532_v32 = vmax.f32 %v437_v31, 0.0  ;;  %1152 = vmatmul.msk.f32.gmra.mxu0 %vm322_vm0, %v298_v30 }
  0x95   : > { %1168 = vmatmul.msk.f32.vlgmr.msra.gmra.mxu1 %vm576_vm1, %v532_v32 }
  0x98   : > { %v439_v33 = vpop.f32.mrf.mxu0 }
  0x99   : > { %v440_v35 = vadd.f32 %v1402_v28, %v439_v33 }
  0x9a   : > { %v511_v17 = vpop.f32.mrf.mxu3 }
  0x9b   : > { %v533_v36 = vmax.f32 %v440_v35, 0.0  ;;  %1153 = vmatmul.msk.f32.gmra.mxu0 %vm322_vm0, %v299_v34 }
  0x9d   : > { %1169 = vmatmul.msk.f32.gmra.mxu1 %vm576_vm1, %v533_v36 }
  0xa0   : > { %v442_v37 = vpop.f32.mrf.mxu0 }
  0xa1   : > { %v443_v39 = vadd.f32 %v1402_v28, %v442_v37 }
  0xa3   : > { %v534_v40 = vmax.f32 %v443_v39, 0.0  ;;  %1154 = vmatmul.msk.f32.gmra.mxu0 %vm322_vm0, %v300_v38  ;;  %v1495_v38 = vld [vmem:[%s1676_s4] ss:$0 sm:$0xff] }
  0xa5   : > { %1170 = vmatmul.msk.f32.gmra.mxu1 %vm576_vm1, %v534_v40 }
  0xa8   : > { %v445_v41 = vpop.f32.mrf.mxu0 }
  0xa9   : > { %v446_v43 = vadd.f32 %v1402_v28, %v445_v41 }
  0xab   : > { %v535_v44 = vmax.f32 %v446_v43, 0.0  ;;  %1155 = vmatmul.msk.f32.gmra.mxu0 %vm322_vm0, %v301_v42 }
  0xad   : > { %1171 = vmatmul.msk.f32.gmra.mxu1 %vm576_vm1, %v535_v44 }
  0xb0   : > { %v448_v45 = vpop.f32.mrf.mxu0 }
  0xb1   : > { %v449_v47 = vadd.f32 %v1402_v28, %v448_v45 }
  0xb3   : > { %v536_v48 = vmax.f32 %v449_v47, 0.0  ;;  %1156 = vmatmul.msk.f32.gmra.mxu0 %vm322_vm0, %v302_v46 }
  0xb5   : > { %1172 = vmatmul.msk.f32.gmra.mxu1 %vm576_vm1, %v536_v48 }
  0xb8   : > { %v451_v50 = vpop.f32.mrf.mxu0 }
  0xb9   : > { %v452_v52 = vadd.f32 %v1402_v28, %v451_v50 }
  0xbb   : > { %v537_v53 = vmax.f32 %v452_v52, 0.0  ;;  %1157 = vmatmul.msk.f32.gmra.mxu0 %vm322_vm0, %v303_v51 }
  0xbd   : > { %1173 = vmatmul.msk.f32.gmra.mxu1 %vm576_vm1, %v537_v53 }
  0xc0   : > { %v454_v55 = vpop.f32.mrf.mxu0 }
  0xc1   : > { %v455_v57 = vadd.f32 %v1402_v28, %v454_v55 }
  0xc3   : > { %v538_v58 = vmax.f32 %v455_v57, 0.0  ;;  %1158 = vmatmul.msk.f32.gmra.mxu0 %vm322_vm0, %v304_v56 }
  0xc5   : > { %1174 = vmatmul.msk.f32.gmra.mxu1 %vm576_vm1, %v538_v58 }
  0xc8   : > { %v457_v60 = vpop.f32.mrf.mxu0 }
  0xc9   : > { %v458_v62 = vadd.f32 %v1402_v28, %v457_v60 }
  0xcb   : > { %v539_v63 = vmax.f32 %v458_v62, 0.0  ;;  %1159 = vmatmul.msk.f32.gmra.mxu0 %vm322_vm0, %v305_v61 }
  0xcd   : > { %1175 = vmatmul.msk.f32.gmra.mxu1 %vm576_vm1, %v539_v63 }
  0xd0   : > { %v460_v1 = vpop.f32.mrf.mxu0 }
  0xd1   : > { %v461_v3 = vadd.f32 %v1402_v28, %v460_v1 }
  0xd3   : > { %v540_v4 = vmax.f32 %v461_v3, 0.0  ;;  %1160 = vmatmul.msk.f32.gmra.mxu0 %vm322_vm0, %v306_v2 }
  0xd5   : > { %1176 = vmatmul.msk.f32.gmra.mxu1 %vm576_vm1, %v540_v4 }
  0xd8   : > { %v463_v6 = vpop.f32.mrf.mxu0 }
  0xd9   : > { %v464_v7 = vadd.f32 %v1402_v28, %v463_v6 }
  0xdb   : > { %v541_v8 = vmax.f32 %v464_v7, 0.0 }
  0xdd   : > { %1177 = vmatmul.msk.f32.gmra.mxu1 %vm576_vm1, %v541_v8 }
  0xe0   : > { %v466_v10 = vpop.f32.mrf.mxu0 }
  0xe1   : > { %v467_v11 = vadd.f32 %v1402_v28, %v466_v10 }
  0xe3   : > { %v542_v12 = vmax.f32 %v467_v11, 0.0 }
  0xe5   : > { %1178 = vmatmul.msk.f32.gmra.mxu1 %vm576_vm1, %v542_v12 }
  0xe8   : > { %v469_v15 = vpop.f32.mrf.mxu0 }
  0xe9   : > { %v470_v16 = vadd.f32 %v1402_v28, %v469_v15 }
  0xeb   : > { %v543_v18 = vmax.f32 %v470_v16, 0.0 }
  0xed   : > { %1179 = vmatmul.msk.f32.gmra.mxu1 %vm576_vm1, %v543_v18 }
  0xf0   : > { %v472_v22 = vpop.f32.mrf.mxu0 }
  0xf1   : > { %v473_v23 = vadd.f32 %v1402_v28, %v472_v22 }
  0xf3   : > { %v544_v25 = vmax.f32 %v473_v23, 0.0 }
  0xf5   : > { %1180 = vmatmul.msk.f32.gmra.mxu1 %vm576_vm1, %v544_v25  ;;  %v514_v25 = vpop.f32.mrf.mxu3 }
  0xf8   : > { %v475_v29 = vpop.f32.mrf.mxu0 }
  0xf9   : > { %v476_v30 = vadd.f32 %v1402_v28, %v475_v29 }
  0xfb   : > { %v545_v31 = vmax.f32 %v476_v30, 0.0 }
  0xfd   : > { %1181 = vmatmul.msk.f32.gmra.mxu1 %vm576_vm1, %v545_v31 }
 0x100   : > { %v478_v32 = vpop.f32.mrf.mxu0 }
 0x101   : > { %v479_v33 = vadd.f32 %v1402_v28, %v478_v32  ;;  %v512_v32 = vadd.f32 %v1402_v28, %v511_v17 }
 0x103   : > { %v546_v34 = vmax.f32 %v479_v33, 0.0  ;;  %v557_v33 = vmax.f32 %v512_v32, 0.0 }
 0x105   : > { %1182 = vmatmul.msk.f32.gmra.mxu1 %vm576_vm1, %v546_v34 }
 0x108   : > { %v481_v35 = vpop.f32.mrf.mxu0 }
 0x109   : > { %v482_v36 = vadd.f32 %v1402_v28, %v481_v35  ;;  %v517_v35 = vpop.f32.mrf.mxu3 }
 0x10b   : > { %v547_v37 = vmax.f32 %v482_v36, 0.0 }
 0x10d   : > { %1183 = vmatmul.msk.f32.gmra.mxu1 %vm576_vm1, %v547_v37 }
 0x110   : > { %v484_v39 = vpop.f32.mrf.mxu0 }
 0x111   : > { %v485_v40 = vadd.f32 %v1402_v28, %v484_v39  ;;  %v515_v39 = vadd.f32 %v1402_v28, %v514_v25 }
 0x112   : > { %v690_v41 = vpop.f32.mrf.mxu1 }
 0x113   : > { %v548_v42 = vmax.f32 %v485_v40, 0.0  ;;  %v691_v43 = vadd.f32 %v1495_v38, %v690_v41  ;;  %v558_v40 = vmax.f32 %v515_v39, 0.0 }
 0x115   : > { %v786_v44 = vmax.f32 %v691_v43, 0.0  ;;  %1184 = vmatmul.msk.f32.gmra.mxu1 %vm576_vm1, %v548_v42  ;;  %v520_v43 = vpop.f32.mrf.mxu3 }
 0x117   : > { %1200 = vmatmul.msk.f32.vlgmr.msra.gmra.mxu2 %vm576_vm1, %v786_v44 }
 0x118   : > { %v487_v45 = vpop.f32.mrf.mxu0 }
 0x119   : > { %v488_v46 = vadd.f32 %v1402_v28, %v487_v45  ;;  %v518_v45 = vadd.f32 %v1402_v28, %v517_v35 }
 0x11a   : > { %v693_v47 = vpop.f32.mrf.mxu1 }
 0x11b   : > { %v549_v48 = vmax.f32 %v488_v46, 0.0  ;;  %v694_v49 = vadd.f32 %v1495_v38, %v693_v47  ;;  %v559_v46 = vmax.f32 %v518_v45, 0.0 }
 0x11d   : > { %v787_v50 = vmax.f32 %v694_v49, 0.0  ;;  %1185 = vmatmul.msk.f32.gmra.mxu1 %vm576_vm1, %v549_v48 }
 0x11f   : > { %1201 = vmatmul.msk.f32.gmra.mxu2 %vm576_vm1, %v787_v50  ;;  %v521_v50 = vadd.f32 %v1402_v28, %v520_v43 }
 0x120   : > { %v490_v51 = vpop.f32.mrf.mxu0 }
 0x121   : > { %v491_v52 = vadd.f32 %v1402_v28, %v490_v51  ;;  %v523_v51 = vpop.f32.mrf.mxu3 }
 0x122   : > { %v696_v53 = vpop.f32.mrf.mxu1 }
 0x123   : > { %v550_v54 = vmax.f32 %v491_v52, 0.0  ;;  %v697_v55 = vadd.f32 %v1495_v38, %v696_v53  ;;  %v560_v52 = vmax.f32 %v521_v50, 0.0 }
 0x125   : > { %v788_v56 = vmax.f32 %v697_v55, 0.0  ;;  %1186 = vmatmul.msk.f32.gmra.mxu1 %vm576_vm1, %v550_v54 }
 0x127   : > { %1202 = vmatmul.msk.f32.gmra.mxu2 %vm576_vm1, %v788_v56  ;;  %v524_v56 = vadd.f32 %v1402_v28, %v523_v51 }
 0x128   : > { %v493_v57 = vpop.f32.mrf.mxu0 }
 0x129   : > { %v494_v58 = vadd.f32 %v1402_v28, %v493_v57  ;;  %v526_v57 = vpop.f32.mrf.mxu3 }
 0x12a   : > { %v699_v59 = vpop.f32.mrf.mxu1 }
 0x12b   : > { %v551_v60 = vmax.f32 %v494_v58, 0.0  ;;  %v700_v61 = vadd.f32 %v1495_v38, %v699_v59  ;;  %v561_v58 = vmax.f32 %v524_v56, 0.0 }
 0x12d   : > { %v789_v62 = vmax.f32 %v700_v61, 0.0  ;;  %1187 = vmatmul.msk.f32.gmra.mxu1 %vm576_vm1, %v551_v60 }
 0x12f   : > { %1203 = vmatmul.msk.f32.gmra.mxu2 %vm576_vm1, %v789_v62  ;;  %v527_v62 = vadd.f32 %v1402_v28, %v526_v57 }
 0x130   : > { %v496_v63 = vpop.f32.mrf.mxu0 }
 0x131   : > { %v497_v0 = vadd.f32 %v1402_v28, %v496_v63  ;;  %v562_v63 = vmax.f32 %v527_v62, 0.0 }
 0x132   : > { %v702_v1 = vpop.f32.mrf.mxu1 }
 0x133   : > { %v552_v2 = vmax.f32 %v497_v0, 0.0  ;;  %v703_v3 = vadd.f32 %v1495_v38, %v702_v1  ;;  %v529_v1 = vpop.f32.mrf.mxu3 }
 0x135   : > { %v790_v4 = vmax.f32 %v703_v3, 0.0  ;;  %1188 = vmatmul.msk.f32.gmra.mxu1 %vm576_vm1, %v552_v2 }
 0x137   : > { %1204 = vmatmul.msk.f32.gmra.mxu2 %vm576_vm1, %v790_v4  ;;  %v530_v4 = vadd.f32 %v1402_v28, %v529_v1 }
 0x138   : > { %v499_v5 = vpop.f32.mrf.mxu0 }
 0x139   : > { %v500_v6 = vadd.f32 %v1402_v28, %v499_v5  ;;  %v563_v5 = vmax.f32 %v530_v4, 0.0 }
 0x13a   : > { %v705_v7 = vpop.f32.mrf.mxu1 }
 0x13b   : > { %v553_v8 = vmax.f32 %v500_v6, 0.0  ;;  %v706_v9 = vadd.f32 %v1495_v38, %v705_v7 }
 0x13d   : > { %v791_v10 = vmax.f32 %v706_v9, 0.0  ;;  %1189 = vmatmul.msk.f32.gmra.mxu1 %vm576_vm1, %v553_v8 }
 0x13f   : > { %1205 = vmatmul.msk.f32.gmra.mxu2 %vm576_vm1, %v791_v10 }
 0x140   : > { %v502_v11 = vpop.f32.mrf.mxu0 }
 0x141   : > { %v503_v12 = vadd.f32 %v1402_v28, %v502_v11 }
 0x142   : > { %v708_v13 = vpop.f32.mrf.mxu1 }
 0x143   : > { %v554_v14 = vmax.f32 %v503_v12, 0.0  ;;  %v709_v15 = vadd.f32 %v1495_v38, %v708_v13 }
 0x145   : > { %v792_v16 = vmax.f32 %v709_v15, 0.0  ;;  %1190 = vmatmul.msk.f32.gmra.mxu1 %vm576_vm1, %v554_v14 }
 0x147   : > { %1206 = vmatmul.msk.f32.gmra.mxu2 %vm576_vm1, %v792_v16 }
 0x148   : > { %v505_v18 = vpop.f32.mrf.mxu0 }
 0x149   : > { %v506_v19 = vadd.f32 %v1402_v28, %v505_v18 }
 0x14a   : > { %v711_v20 = vpop.f32.mrf.mxu1 }
 0x14b   : > { %v555_v21 = vmax.f32 %v506_v19, 0.0  ;;  %v712_v22 = vadd.f32 %v1495_v38, %v711_v20 }
 0x14d   : > { %v793_v23 = vmax.f32 %v712_v22, 0.0  ;;  %1191 = vmatmul.msk.f32.gmra.mxu1 %vm576_vm1, %v555_v21 }
 0x14f   : > { %1207 = vmatmul.msk.f32.gmra.mxu2 %vm576_vm1, %v793_v23 }
 0x150   : > { %v508_v24 = vpop.f32.mrf.mxu0 }
 0x151   : > { %v509_v26 = vadd.f32 %v1402_v28, %v508_v24  ;;  %v1566_v28 = vld [vmem:[%s1678_s6] ss:$0 sm:$0xff] }
 0x152   : > { %v714_v27 = vpop.f32.mrf.mxu1 }
 0x153   : > { %v556_v29 = vmax.f32 %v509_v26, 0.0  ;;  %v715_v30 = vadd.f32 %v1495_v38, %v714_v27 }
 0x155   : > { %v794_v31 = vmax.f32 %v715_v30, 0.0  ;;  %1192 = vmatmul.msk.f32.vlgmr.msrb.gmra.mxu3 %vm576_vm1, %v556_v29 }
 0x157   : > { %1208 = vmatmul.msk.f32.gmra.mxu2 %vm576_vm1, %v794_v31 }
 0x15a   : > { %v717_v34 = vpop.f32.mrf.mxu1 }
 0x15b   : > { %v718_v36 = vadd.f32 %v1495_v38, %v717_v34 }
 0x15d   : > { %v795_v37 = vmax.f32 %v718_v36, 0.0  ;;  %1193 = vmatmul.msk.f32.gmra.mxu3 %vm576_vm1, %v557_v33 }
 0x15f   : > { %1209 = vmatmul.msk.f32.gmra.mxu2 %vm576_vm1, %v795_v37 }
 0x162   : > { %v720_v41 = vpop.f32.mrf.mxu1 }
 0x163   : > { %v721_v42 = vadd.f32 %v1495_v38, %v720_v41 }
 0x165   : > { %v796_v44 = vmax.f32 %v721_v42, 0.0  ;;  %1194 = vmatmul.msk.f32.gmra.mxu3 %vm576_vm1, %v558_v40 }
 0x167   : > { %1210 = vmatmul.msk.f32.gmra.mxu2 %vm576_vm1, %v796_v44 }
 0x16a   : > { %v723_v47 = vpop.f32.mrf.mxu1 }
 0x16b   : > { %v724_v48 = vadd.f32 %v1495_v38, %v723_v47 }
 0x16d   : > { %v797_v49 = vmax.f32 %v724_v48, 0.0  ;;  %1195 = vmatmul.msk.f32.gmra.mxu3 %vm576_vm1, %v559_v46 }
 0x16f   : > { %1211 = vmatmul.msk.f32.gmra.mxu2 %vm576_vm1, %v797_v49 }
 0x172   : > { %v726_v53 = vpop.f32.mrf.mxu1 }
 0x173   : > { %v727_v54 = vadd.f32 %v1495_v38, %v726_v53 }
 0x175   : > { %v798_v55 = vmax.f32 %v727_v54, 0.0  ;;  %1196 = vmatmul.msk.f32.gmra.mxu3 %vm576_vm1, %v560_v52 }
 0x177   : > { %1212 = vmatmul.msk.f32.gmra.mxu2 %vm576_vm1, %v798_v55 }
 0x17a   : > { %v729_v59 = vpop.f32.mrf.mxu1 }
 0x17b   : > { %v730_v60 = vadd.f32 %v1495_v38, %v729_v59 }
 0x17d   : > { %v799_v61 = vmax.f32 %v730_v60, 0.0  ;;  %1197 = vmatmul.msk.f32.gmra.mxu3 %vm576_vm1, %v561_v58 }
 0x17f   : > { %1213 = vmatmul.msk.f32.gmra.mxu2 %vm576_vm1, %v799_v61 }
 0x182   : > { %v732_v0 = vpop.f32.mrf.mxu1 }
 0x183   : > { %v733_v2 = vadd.f32 %v1495_v38, %v732_v0 }
 0x185   : > { %v800_v3 = vmax.f32 %v733_v2, 0.0  ;;  %1198 = vmatmul.msk.f32.gmra.mxu3 %vm576_vm1, %v562_v63 }
 0x187   : > { %1214 = vmatmul.msk.f32.gmra.mxu2 %vm576_vm1, %v800_v3 }
 0x18a   : > { %v735_v6 = vpop.f32.mrf.mxu1 }
 0x18b   : > { %v736_v7 = vadd.f32 %v1495_v38, %v735_v6 }
 0x18d   : > { %v801_v8 = vmax.f32 %v736_v7, 0.0  ;;  %1199 = vmatmul.msk.f32.gmra.mxu3 %vm576_vm1, %v563_v5 }
 0x18f   : > { %1215 = vmatmul.msk.f32.gmra.mxu2 %vm576_vm1, %v801_v8 }
 0x192   : > { %v738_v9 = vpop.f32.mrf.mxu1 }
 0x193   : > { %v739_v10 = vadd.f32 %v1495_v38, %v738_v9 }
 0x195   : > { %v802_v11 = vmax.f32 %v739_v10, 0.0 }
 0x197   : > { %1216 = vmatmul.msk.f32.gmra.mxu2 %vm576_vm1, %v802_v11 }
 0x19a   : > { %v741_v12 = vpop.f32.mrf.mxu1  ;;  %v943_v13 = vpop.f32.mrf.mxu2 }
 0x19b   : > { %v742_v14 = vadd.f32 %v1495_v38, %v741_v12  ;;  %v944_v15 = vadd.f32 %v1566_v28, %v943_v13 }
 0x19d   : > { %v803_v16 = vmax.f32 %v742_v14, 0.0  ;;  %1039 = vst [vmem:[%s1573_s17] sm:$0xff] %v944_v15 }
 0x19f   : > { %1217 = vmatmul.msk.f32.gmra.mxu2 %vm576_vm1, %v803_v16 }
 0x1a2   : > { %v744_v17 = vpop.f32.mrf.mxu1  ;;  %v946_v18 = vpop.f32.mrf.mxu2 }
 0x1a3   : > { %v745_v19 = vadd.f32 %v1495_v38, %v744_v17  ;;  %v947_v20 = vadd.f32 %v1566_v28, %v946_v18 }
 0x1a5   : > { %v804_v21 = vmax.f32 %v745_v19, 0.0  ;;  %1040 = vst [vmem:[%s1573_s17 + $0x8] sm:$0xff] %v947_v20 }
 0x1a7   : > { %1218 = vmatmul.msk.f32.gmra.mxu2 %vm576_vm1, %v804_v21 }
 0x1aa   : > { %v747_v22 = vpop.f32.mrf.mxu1  ;;  %v949_v23 = vpop.f32.mrf.mxu2 }
 0x1ab   : > { %v748_v24 = vadd.f32 %v1495_v38, %v747_v22  ;;  %v950_v25 = vadd.f32 %v1566_v28, %v949_v23 }
 0x1ad   : > { %v805_v26 = vmax.f32 %v748_v24, 0.0  ;;  %1041 = vst [vmem:[%s1573_s17 + $0x10] sm:$0xff] %v950_v25 }
 0x1af   : > { %1219 = vmatmul.msk.f32.gmra.mxu2 %vm576_vm1, %v805_v26 }
 0x1b2   : > { %v750_v27 = vpop.f32.mrf.mxu1  ;;  %v952_v29 = vpop.f32.mrf.mxu2 }
 0x1b3   : > { %v751_v30 = vadd.f32 %v1495_v38, %v750_v27  ;;  %v953_v31 = vadd.f32 %v1566_v28, %v952_v29 }
 0x1b5   : > { %v806_v32 = vmax.f32 %v751_v30, 0.0  ;;  %1042 = vst [vmem:[%s1573_s17 + $0x18] sm:$0xff] %v953_v31 }
 0x1b7   : > { %1220 = vmatmul.msk.f32.gmra.mxu2 %vm576_vm1, %v806_v32 }
 0x1ba   : > { %v753_v33 = vpop.f32.mrf.mxu1  ;;  %v955_v34 = vpop.f32.mrf.mxu2 }
 0x1bb   : > { %v754_v35 = vadd.f32 %v1495_v38, %v753_v33  ;;  %v956_v36 = vadd.f32 %v1566_v28, %v955_v34 }
 0x1bd   : > { %v807_v37 = vmax.f32 %v754_v35, 0.0  ;;  %1043 = vst [vmem:[%s1573_s17 + $0x20] sm:$0xff] %v956_v36 }
 0x1bf   : > { %1221 = vmatmul.msk.f32.gmra.mxu2 %vm576_vm1, %v807_v37 }
 0x1c2   : > { %v756_v39 = vpop.f32.mrf.mxu1  ;;  %v958_v40 = vpop.f32.mrf.mxu2 }
 0x1c3   : > { %v757_v41 = vadd.f32 %v1495_v38, %v756_v39  ;;  %v959_v42 = vadd.f32 %v1566_v28, %v958_v40 }
 0x1c5   : > { %v808_v43 = vmax.f32 %v757_v41, 0.0  ;;  %1044 = vst [vmem:[%s1573_s17 + $0x28] sm:$0xff] %v959_v42 }
 0x1c7   : > { %1222 = vmatmul.msk.f32.gmra.mxu2 %vm576_vm1, %v808_v43 }
 0x1ca   : > { %v759_v44 = vpop.f32.mrf.mxu1  ;;  %v961_v45 = vpop.f32.mrf.mxu2 }
 0x1cb   : > { %v760_v46 = vadd.f32 %v1495_v38, %v759_v44  ;;  %v962_v47 = vadd.f32 %v1566_v28, %v961_v45 }
 0x1cd   : > { %v809_v48 = vmax.f32 %v760_v46, 0.0  ;;  %1045 = vst [vmem:[%s1573_s17 + $0x30] sm:$0xff] %v962_v47 }
 0x1cf   : > { %1223 = vmatmul.msk.f32.gmra.mxu2 %vm576_vm1, %v809_v48 }
 0x1d2   : > { %v964_v49 = vpop.f32.mrf.mxu2 }
 0x1d3   : > { %v965_v50 = vadd.f32 %v1566_v28, %v964_v49 }
 0x1d5   : > { %1046 = vst [vmem:[%s1573_s17 + $0x38] sm:$0xff] %v965_v50 }
 0x1d8   : > { %v762_v51 = vpop.f32.mrf.mxu3 }
 0x1d9   : > { %v763_v52 = vadd.f32 %v1495_v38, %v762_v51 }
 0x1da   : > { %v967_v53 = vpop.f32.mrf.mxu2 }
 0x1db   : > { %v810_v54 = vmax.f32 %v763_v52, 0.0  ;;  %v968_v55 = vadd.f32 %v1566_v28, %v967_v53 }
 0x1dd   : > { %1047 = vst [vmem:[%s1573_s17 + $0x40] sm:$0xff] %v968_v55  ;;  %1224 = vmatmul.msk.f32.vlgmr.msra.gmra.mxu3 %vm576_vm1, %v810_v54 }
 0x1e0   : > { %v765_v56 = vpop.f32.mrf.mxu3 }
 0x1e1   : > { %v766_v57 = vadd.f32 %v1495_v38, %v765_v56 }
 0x1e2   : > { %v970_v58 = vpop.f32.mrf.mxu2 }
 0x1e3   : > { %v811_v59 = vmax.f32 %v766_v57, 0.0  ;;  %v971_v60 = vadd.f32 %v1566_v28, %v970_v58 }
 0x1e5   : > { %1048 = vst [vmem:[%s1573_s17 + $0x48] sm:$0xff] %v971_v60  ;;  %1225 = vmatmul.msk.f32.gmra.mxu3 %vm576_vm1, %v811_v59 }
 0x1e8   : > { %v768_v61 = vpop.f32.mrf.mxu3 }
 0x1e9   : > { %v769_v62 = vadd.f32 %v1495_v38, %v768_v61 }
 0x1ea   : > { %v973_v63 = vpop.f32.mrf.mxu2 }
 0x1eb   : > { %v812_v0 = vmax.f32 %v769_v62, 0.0  ;;  %v974_v1 = vadd.f32 %v1566_v28, %v973_v63 }
 0x1ed   : > { %1049 = vst [vmem:[%s1573_s17 + $0x50] sm:$0xff] %v974_v1  ;;  %1226 = vmatmul.msk.f32.gmra.mxu3 %vm576_vm1, %v812_v0 }
 0x1f0   : > { %v771_v2 = vpop.f32.mrf.mxu3 }
 0x1f1   : > { %v772_v3 = vadd.f32 %v1495_v38, %v771_v2 }
 0x1f2   : > { %v976_v4 = vpop.f32.mrf.mxu2 }
 0x1f3   : > { %v813_v5 = vmax.f32 %v772_v3, 0.0  ;;  %v977_v6 = vadd.f32 %v1566_v28, %v976_v4 }
 0x1f5   : > { %1050 = vst [vmem:[%s1573_s17 + $0x58] sm:$0xff] %v977_v6  ;;  %1227 = vmatmul.msk.f32.gmra.mxu3 %vm576_vm1, %v813_v5 }
 0x1f8   : > { %v774_v7 = vpop.f32.mrf.mxu3 }
 0x1f9   : > { %v775_v8 = vadd.f32 %v1495_v38, %v774_v7 }
 0x1fa   : > { %v979_v9 = vpop.f32.mrf.mxu2 }
 0x1fb   : > { %v814_v10 = vmax.f32 %v775_v8, 0.0  ;;  %v980_v11 = vadd.f32 %v1566_v28, %v979_v9 }
 0x1fd   : > { %1051 = vst [vmem:[%s1573_s17 + $0x60] sm:$0xff] %v980_v11  ;;  %1228 = vmatmul.msk.f32.gmra.mxu3 %vm576_vm1, %v814_v10 }
 0x200   : > { %v777_v12 = vpop.f32.mrf.mxu3 }
 0x201   : > { %v778_v13 = vadd.f32 %v1495_v38, %v777_v12 }
 0x202   : > { %v982_v14 = vpop.f32.mrf.mxu2 }
 0x203   : > { %v815_v15 = vmax.f32 %v778_v13, 0.0  ;;  %v983_v16 = vadd.f32 %v1566_v28, %v982_v14 }
 0x205   : > { %1052 = vst [vmem:[%s1573_s17 + $0x68] sm:$0xff] %v983_v16  ;;  %1229 = vmatmul.msk.f32.gmra.mxu3 %vm576_vm1, %v815_v15 }
 0x208   : > { %v780_v17 = vpop.f32.mrf.mxu3 }
 0x209   : > { %v781_v18 = vadd.f32 %v1495_v38, %v780_v17 }
 0x20a   : > { %v985_v19 = vpop.f32.mrf.mxu2 }
 0x20b   : > { %v816_v20 = vmax.f32 %v781_v18, 0.0  ;;  %v986_v21 = vadd.f32 %v1566_v28, %v985_v19 }
 0x20d   : > { %1053 = vst [vmem:[%s1573_s17 + $0x70] sm:$0xff] %v986_v21  ;;  %1230 = vmatmul.msk.f32.gmra.mxu3 %vm576_vm1, %v816_v20 }
 0x210   : > { %v783_v22 = vpop.f32.mrf.mxu3 }
 0x211   : > { %v784_v23 = vadd.f32 %v1495_v38, %v783_v22 }
 0x212   : > { %v988_v24 = vpop.f32.mrf.mxu2 }
 0x213   : > { %v817_v25 = vmax.f32 %v784_v23, 0.0  ;;  %v989_v26 = vadd.f32 %v1566_v28, %v988_v24 }
 0x215   : > { %1054 = vst [vmem:[%s1573_s17 + $0x78] sm:$0xff] %v989_v26  ;;  %1231 = vmatmul.msk.f32.gmra.mxu3 %vm576_vm1, %v817_v25 }
 0x21a   : > { %v991_v27 = vpop.f32.mrf.mxu2 }
 0x21b   : > { %v992_v29 = vadd.f32 %v1566_v28, %v991_v27 }
 0x21d   : > { %1055 = vst [vmem:[%s1573_s17 + $0x80] sm:$0xff] %v992_v29 }
 0x222   : > { %v994_v30 = vpop.f32.mrf.mxu2 }
 0x223   : > { %v995_v31 = vadd.f32 %v1566_v28, %v994_v30 }
 0x225   : > { %1056 = vst [vmem:[%s1573_s17 + $0x88] sm:$0xff] %v995_v31 }
 0x22a   : > { %v997_v38 = vpop.f32.mrf.mxu2 }
 0x22b   : > { %v998_v32 = vadd.f32 %v1566_v28, %v997_v38 }
 0x22d   : > { %1057 = vst [vmem:[%s1573_s17 + $0x90] sm:$0xff] %v998_v32 }
 0x232   : > { %v1000_v33 = vpop.f32.mrf.mxu2 }
 0x233   : > { %v1001_v34 = vadd.f32 %v1566_v28, %v1000_v33 }
 0x235   : > { %1058 = vst [vmem:[%s1573_s17 + $0x98] sm:$0xff] %v1001_v34 }
 0x23a   : > { %v1003_v35 = vpop.f32.mrf.mxu2 }
 0x23b   : > { %v1004_v36 = vadd.f32 %v1566_v28, %v1003_v35 }
 0x23d   : > { %1059 = vst [vmem:[%s1573_s17 + $0xa0] sm:$0xff] %v1004_v36 }
 0x242   : > { %v1006_v37 = vpop.f32.mrf.mxu2 }
 0x243   : > { %v1007_v39 = vadd.f32 %v1566_v28, %v1006_v37 }
 0x245   : > { %1060 = vst [vmem:[%s1573_s17 + $0xa8] sm:$0xff] %v1007_v39 }
 0x24a   : > { %v1009_v40 = vpop.f32.mrf.mxu2 }
 0x24b   : > { %v1010_v41 = vadd.f32 %v1566_v28, %v1009_v40 }
 0x24d   : > { %1061 = vst [vmem:[%s1573_s17 + $0xb0] sm:$0xff] %v1010_v41 }
 0x252   : > { %v1012_v42 = vpop.f32.mrf.mxu2 }
 0x253   : > { %v1013_v43 = vadd.f32 %v1566_v28, %v1012_v42 }
 0x255   : > { %1062 = vst [vmem:[%s1573_s17 + $0xb8] sm:$0xff] %v1013_v43 }
 0x260   : > { %v1015_v44 = vpop.f32.mrf.mxu3 }
 0x261   : > { %v1016_v45 = vadd.f32 %v1566_v28, %v1015_v44 }
 0x263   : > { %1063 = vst [vmem:[%s1573_s17 + $0xc0] sm:$0xff] %v1016_v45 }
 0x268   : > { %v1018_v46 = vpop.f32.mrf.mxu3 }
 0x269   : > { %v1019_v47 = vadd.f32 %v1566_v28, %v1018_v46 }
 0x26b   : > { %1064 = vst [vmem:[%s1573_s17 + $0xc8] sm:$0xff] %v1019_v47 }
 0x270   : > { %v1021_v48 = vpop.f32.mrf.mxu3 }
 0x271   : > { %v1022_v49 = vadd.f32 %v1566_v28, %v1021_v48 }
 0x273   : > { %1065 = vst [vmem:[%s1573_s17 + $0xd0] sm:$0xff] %v1022_v49 }
 0x278   : > { %v1024_v50 = vpop.f32.mrf.mxu3 }
 0x279   : > { %v1025_v51 = vadd.f32 %v1566_v28, %v1024_v50 }
 0x27b   : > { %1066 = vst [vmem:[%s1573_s17 + $0xd8] sm:$0xff] %v1025_v51 }
 0x280   : > { %v1027_v52 = vpop.f32.mrf.mxu3 }
 0x281   : > { %v1028_v53 = vadd.f32 %v1566_v28, %v1027_v52 }
 0x283   : > { %1067 = vst [vmem:[%s1573_s17 + $0xe0] sm:$0xff] %v1028_v53 }
 0x288   : > { %v1030_v54 = vpop.f32.mrf.mxu3 }
 0x289   : > { %v1031_v55 = vadd.f32 %v1566_v28, %v1030_v54 }
 0x28b   : > { %1068 = vst [vmem:[%s1573_s17 + $0xe8] sm:$0xff] %v1031_v55 }
 0x290   : > { %v1033_v56 = vpop.f32.mrf.mxu3 }
 0x291   : > { %v1034_v57 = vadd.f32 %v1566_v28, %v1033_v56 }
 0x293   : > { %1069 = vst [vmem:[%s1573_s17 + $0xf0] sm:$0xff] %v1034_v57 }
 0x298   : > { %v1036_v58 = vpop.f32.mrf.mxu3 }
 0x299   : > { %v1037_v59 = vadd.f32 %v1566_v28, %v1036_v58 }
 0x29b   : > { %1070 = vst [vmem:[%s1573_s17 + $0xf8] sm:$0xff] %v1037_v59 }
 0x29c PF: > { %s17_s24 = sadd.s32 1, %s1271_s24  }
 0x29d   : > { %p14_p4 = scmp.ge.s32.totalorder %s17_s24, 4  }
 0x29f   :  { %16 = sbr.rel (!%p14_p4) target bundleno = 1 (0x1), region = 78 }

</bundles_post_ra>
